<compile_context>
chip_gen: v6e
topology: v6e:2x2x1
jax: 0.10.0
libtpu: 0.0.40
codegen_flags: <defaults>
</compile_context>

<pallas_src>
import functools

import jax
import jax.numpy as jnp
from jax import lax
from jax.experimental import pallas as pl
from jax.experimental.pallas import tpu as pltpu

_LANES = 128
_MAX_TILE_ROWS = 512  # 512 x 128 f32 = 256 KiB per input block (x2 inputs x2 bufs ~ 1 MiB)


def _round_up(x, m):
    return ((x + m - 1) // m) * m


def _bce(p, y):
    # -y*log(p) - (1-y)*log(1-p), with log1p(-p) for precision near p ~ 1.
    return -(y * jnp.log(p) + (1.0 - y) * jnp.log1p(-p))


def _bce_partial_sum_kernel(pred_ref, label_ref, out_ref, *, n_valid, n_padded):
    """Per grid step: per-lane partial sums of the (masked) BCE loss."""
    i = pl.program_id(0)
    p = pred_ref[...].astype(jnp.float32)
    y = label_ref[...].astype(jnp.float32)
    loss = _bce(p, y)

    tile_r, lanes = loss.shape
    if n_valid != n_padded:  # static: only mask when padding actually exists
        row = lax.broadcasted_iota(jnp.int32, (tile_r, lanes), 0)
        lane = lax.broadcasted_iota(jnp.int32, (tile_r, lanes), 1)
        gidx = (i * tile_r + row) * lanes + lane
        loss = jnp.where(gidx < n_valid, loss, 0.0)

    # (tile_r, 128) -> (1, 128) per-lane partials; store into (1, 1, 128) block.
    out_ref[...] = jnp.sum(loss, axis=0, keepdims=True).reshape(1, 1, lanes)


def _bce_elementwise_kernel(pred_ref, label_ref, out_ref):
    p = pred_ref[...].astype(jnp.float32)
    y = label_ref[...].astype(jnp.float32)
    out_ref[...] = _bce(p, y)


def _lane_dense(x, rows, pad_value):
    """Flatten, pad to rows*128 elements, reshape to (rows, 128). Keeps dtype."""
    flat = x.reshape(-1)
    n = flat.shape[0]
    padded = rows * _LANES
    if padded != n:
        flat = jnp.pad(flat, (0, padded - n), constant_values=pad_value)
    return flat.reshape(rows, _LANES)


def wx_binary_cross_entropy_loss(y_pred, y_label, reduction="mean"):
    """Matches WxBinaryCrossEntropyLoss.forward.

    y_pred:  (bs, 1) probabilities in (0, 1)
    y_label: (bs, 1) labels (hard or soft)
    reduction: 'mean' (default) | 'sum' | anything else -> elementwise loss
    """
    assert y_pred.shape == y_label.shape
    orig_shape = y_pred.shape
    n = 1
    for d in orig_shape:
        n *= int(d)

    rows_raw = pl.cdiv(n, _LANES)
    tile_rows = min(_MAX_TILE_ROWS, _round_up(rows_raw, 8))
    rows = _round_up(rows_raw, tile_rows)
    n_padded = rows * _LANES
    num_blocks = rows // tile_rows

    # Pad y_pred with 0.5 (keeps logs finite in padded lanes); mask/slice later.
    pred2d = _lane_dense(y_pred, rows, 0.5)
    label2d = _lane_dense(y_label, rows, 0.0)

    in_specs = [
        pl.BlockSpec((tile_rows, _LANES), lambda i: (i, 0)),
        pl.BlockSpec((tile_rows, _LANES), lambda i: (i, 0)),
    ]
    in_bytes = n_padded * (pred2d.dtype.itemsize + label2d.dtype.itemsize)

    if reduction in ("mean", "sum"):
        kernel = functools.partial(
            _bce_partial_sum_kernel, n_valid=n, n_padded=n_padded)
        partials = pl.pallas_call(
            kernel,
            out_shape=jax.ShapeDtypeStruct((num_blocks, 1, _LANES), jnp.float32),
            grid=(num_blocks,),
            in_specs=in_specs,
            out_specs=pl.BlockSpec((1, 1, _LANES), lambda i: (i, 0, 0)),
            compiler_params=pltpu.CompilerParams(
                dimension_semantics=("parallel",)),
            cost_estimate=pl.CostEstimate(
                flops=6 * n_padded,
                transcendentals=2 * n_padded,
                bytes_accessed=in_bytes + num_blocks * _LANES * 4),
        )(pred2d, label2d)
        total = jnp.sum(partials)  # tiny final reduce outside the kernel
        if reduction == "mean":
            return total / jnp.float32(n)  # denominator = ORIGINAL element count
        return total

    # 'none' (or any other string): elementwise loss, original shape restored.
    out2d = pl.pallas_call(
        _bce_elementwise_kernel,
        out_shape=jax.ShapeDtypeStruct((rows, _LANES), jnp.float32),
        grid=(num_blocks,),
        in_specs=in_specs,
        out_specs=pl.BlockSpec((tile_rows, _LANES), lambda i: (i, 0)),
        compiler_params=pltpu.CompilerParams(
            dimension_semantics=("parallel",)),
        cost_estimate=pl.CostEstimate(
            flops=6 * n_padded,
            transcendentals=2 * n_padded,
            bytes_accessed=in_bytes + n_padded * 4),
    )(pred2d, label2d)
    return out2d.reshape(-1)[:n].reshape(orig_shape)


if __name__ == "__main__":
    key = jax.random.PRNGKey(0)

    def make_inputs(bs):
        kp, kl = jax.random.split(jax.random.fold_in(key, bs))
        # Probabilities strictly inside (0, 1) -- same contract as the module.
        y_pred = jax.random.uniform(kp, (bs, 1), jnp.float32,
                                    minval=1e-3, maxval=1.0 - 1e-3)
        y_label = jax.random.bernoulli(kl, 0.5, (bs, 1)).astype(jnp.float32)
        return y_pred, y_label

    def ref_loss(y_pred, y_label):
        return -y_label * jnp.log(y_pred) - (1.0 - y_label) * jnp.log1p(-y_pred)

    # bs=8: primary small case (padding + mask). bs=1024: exact-tile, no mask.
    # bs=70000: multi-block grid (2 parallel tiles) + padding.
    for bs in (8, 1024, 70000):
        y_pred, y_label = make_inputs(bs)
        ref = ref_loss(y_pred, y_label)

        got_mean = jax.block_until_ready(
            wx_binary_cross_entropy_loss(y_pred, y_label, reduction="mean"))
        assert jnp.allclose(got_mean, jnp.mean(ref), rtol=1e-5, atol=1e-6), (
            bs, got_mean, jnp.mean(ref))

        got_sum = jax.block_until_ready(
            wx_binary_cross_entropy_loss(y_pred, y_label, reduction="sum"))
        assert jnp.allclose(got_sum, jnp.sum(ref), rtol=1e-5, atol=1e-5), (
            bs, got_sum, jnp.sum(ref))

        got_none = jax.block_until_ready(
            wx_binary_cross_entropy_loss(y_pred, y_label, reduction="none"))
        assert got_none.shape == (bs, 1)
        assert jnp.allclose(got_none, ref, rtol=1e-5, atol=1e-6), bs

    print("KERNEL_OK")
</pallas_src>

<mosaic_0001>
module attributes {stable_mosaic.version = 11 : i64} {
  func.func @_bce_partial_sum_kernel(%arg0: i32, %arg1: memref<8x128xf32, #tpu.memory_space<vmem>>, %arg2: memref<8x128xf32, #tpu.memory_space<vmem>>, %arg3: memref<1x1x128xf32, #tpu.memory_space<vmem>>) attributes {dimension_semantics = [#tpu.dimension_semantics<parallel>], iteration_bounds = array<i64: 1>, scalar_prefetch = 0 : i64, scratch_operands = 0 : i64, tpu.core_type = #tpu.core_type<tc>, window_params = [{transform_indices = @transform_0, window_bounds = array<i64: 8, 128>}, {transform_indices = @transform_1, window_bounds = array<i64: 8, 128>}, {transform_indices = @transform_2, window_bounds = array<i64: 1, 1, 128>}]} {
    %c0 = arith.constant 0 : index
    %c0_0 = arith.constant 0 : index
    %0 = vector.load %arg1[%c0, %c0_0] : memref<8x128xf32, #tpu.memory_space<vmem>>, vector<8x128xf32>
    %c0_1 = arith.constant 0 : index
    %c0_2 = arith.constant 0 : index
    %1 = vector.load %arg2[%c0_1, %c0_2] : memref<8x128xf32, #tpu.memory_space<vmem>>, vector<8x128xf32>
    %2 = math.log %0 : vector<8x128xf32>
    %3 = arith.mulf %1, %2 : vector<8x128xf32>
    %cst = arith.constant 1.000000e+00 : f32
    %4 = vector.broadcast %cst : f32 to vector<8x128xf32>
    %5 = arith.subf %4, %1 : vector<8x128xf32>
    %cst_3 = arith.constant 0.000000e+00 : f32
    %6 = vector.broadcast %cst_3 : f32 to vector<8x128xf32>
    %7 = arith.subf %6, %0 : vector<8x128xf32>
    %8 = math.log1p %7 : vector<8x128xf32>
    %9 = arith.mulf %5, %8 : vector<8x128xf32>
    %10 = arith.addf %3, %9 : vector<8x128xf32>
    %cst_4 = arith.constant 0.000000e+00 : f32
    %11 = vector.broadcast %cst_4 : f32 to vector<8x128xf32>
    %12 = arith.subf %11, %10 : vector<8x128xf32>
    %13 = tpu.iota {dimensions = array<i32: 0>} : vector<8x128xi32>
    %14 = tpu.iota {dimensions = array<i32: 1>} : vector<8x128xi32>
    %c8_i32 = arith.constant 8 : i32
    %15 = arith.muli %arg0, %c8_i32 : i32
    %16 = vector.broadcast %15 : i32 to vector<8x128xi32>
    %17 = arith.addi %16, %13 : vector<8x128xi32>
    %c128_i32 = arith.constant 128 : i32
    %18 = vector.broadcast %c128_i32 : i32 to vector<8x128xi32>
    %19 = arith.muli %17, %18 : vector<8x128xi32>
    %20 = arith.addi %19, %14 : vector<8x128xi32>
    %c8_i32_5 = arith.constant 8 : i32
    %21 = vector.broadcast %c8_i32_5 : i32 to vector<8x128xi32>
    %22 = arith.cmpi slt, %20, %21 : vector<8x128xi32>
    %cst_6 = arith.constant 0.000000e+00 : f32
    %23 = vector.broadcast %cst_6 : f32 to vector<8x128xf32>
    %24 = arith.select %22, %12, %23 : vector<8x128xi1>, vector<8x128xf32>
    %cst_7 = arith.constant dense<0.000000e+00> : vector<128xf32>
    %25 = vector.multi_reduction <add>, %24, %cst_7 [0] : vector<8x128xf32> to vector<128xf32>
    %26 = vector.shape_cast %25 : vector<128xf32> to vector<1x128xf32>
    %27 = vector.shape_cast %26 : vector<1x128xf32> to vector<1x1x128xf32>
    %c0_8 = arith.constant 0 : index
    %c0_9 = arith.constant 0 : index
    %c0_10 = arith.constant 0 : index
    %28 = vector.load %arg3[%c0_8, %c0_9, %c0_10] : memref<1x1x128xf32, #tpu.memory_space<vmem>>, vector<1x1x128xf32>
    tpu.vector_store %arg3[%c0_8, %c0_9, %c0_10], %27 {strides = array<i32>} : memref<1x1x128xf32, #tpu.memory_space<vmem>>, vector<1x1x128xf32>,
    return
  }
  func.func @transform_0(%arg0: i32) -> (i32, i32) {
    %c0_i32 = arith.constant 0 : i32
    %c0_i32_0 = arith.constant 0 : i32
    return %arg0, %c0_i32 : i32, i32
  }
  func.func @transform_1(%arg0: i32) -> (i32, i32) {
    %c0_i32 = arith.constant 0 : i32
    %c0_i32_0 = arith.constant 0 : i32
    return %arg0, %c0_i32 : i32, i32
  }
  func.func @transform_2(%arg0: i32) -> (i32, i32, i32) {
    %c0_i32 = arith.constant 0 : i32
    %c0_i32_0 = arith.constant 0 : i32
    %c0_i32_1 = arith.constant 0 : i32
    return %arg0, %c0_i32, %c0_i32_0 : i32, i32, i32
  }
}

</mosaic_0001>

<bundles_post_ra>
// kernel: tpu_custom_call.1
= control target key start
LH: loop header
LB: loop body
LE: loop exit
PB: predicated region body
PF: predicated region fallthrough
CT: control target
= control target key end

     0   :  { %7 = vsyncpa [#allocation3], 0  ;;  %s189_s0 = inlined_call_operand.hbm [shape: f32[8,128], index: 0, kind: input, shape index: {}]   ;;  %s190_s1 = inlined_call_operand.hbm [shape: f32[8,128], index: 1, kind: input, shape index: {}]   ;;  %s191_s2 = inlined_call_operand.hbm [shape: f32[1,1,128], index: 2, kind: output, shape index: {}]  }
   0x1   :  { %8 = vsyncpa [#allocation6], 0 }
   0x2   :  { %9 = vsyncpa [#allocation4], 0  ;;  %s162_s9 = smov [#allocation2]   ;;  %s163_s11 = smov [#allocation5]  }
   0x3   :  { %s16_s10 = sshll.u32 %s162_s9, 4  ;;  %s26_s12 = sshll.u32 %s163_s11, 4  ;;  %s17_s10 = int_to_ptr.vmem [resolvable:$true] %s16_s10  ;;  %s27_s12 = int_to_ptr.vmem [resolvable:$true] %s26_s12 }
   0x4   :  { %s104_s13 = scalar_lea.vmem %s17_s10, 128  ;;  %p109_p1 = scmp.lt.s32.totalorder %s17_s10, %s17_s10 }
   0x5   :  { %p105_p0 = scmp.ne.s32.totalorder %s17_s10, %s104_s13  ;;  %p110_p2 = scmp.lt.s32.totalorder %s104_s13, %s104_s13 }
   0x7   :  { %p111_p3 = por %p110_p2, %p109_p1 }
   0x9   :  { %p112_p4 = pnand %p111_p3, %p105_p0 }
   0xb   :  { %115 = shalt.err (!%p112_p4)
}
   0xc   :  { %19 = dma.hbm_to_vmem [thread:$0]  %s189_s0, 128, %s17_s10, [#allocation3]  }
   0xd   :  { %s124_s16 = scalar_lea.vmem %s27_s12, 128  ;;  %p129_p6 = scmp.lt.s32.totalorder %s27_s12, %s27_s12 }
   0xe   :  { %p125_p5 = scmp.ne.s32.totalorder %s27_s12, %s124_s16  ;;  %p130_p7 = scmp.lt.s32.totalorder %s124_s16, %s124_s16 }
  0x10   :  { %p131_p8 = por %p130_p7, %p129_p6 }
  0x12   :  { %p132_p9 = pnand %p131_p8, %p125_p5 }
  0x14   :  { %135 = shalt.err (!%p132_p9)
}
  0x15   :  { %29 = dma.hbm_to_vmem [thread:$0]  %s190_s1, 128, %s27_s12, [#allocation6]  }
  0x16   :  { %156 = dma.done.wait [#allocation3], 128  }
  0x17   :  { %157 = vsyncadd [#allocation3], 4294967168 }
  0x18   :  { %158 = dma.done.wait [#allocation6], 128  }
  0x19   :  { %159 = vsyncadd [#allocation6], 4294967168  ;;  %v36_v0 = vld [vmem:[#allocation2] sm:$0xff]  ;;  %v55_v4 = vlaneseq  ;;  %v37_v9 = vld [vmem:[#allocation5] sm:$0xff]  ;;  %s164_s0 = smov [#allocation7]  }
  0x1a   :  { %92 = vlog2.f32 %v36_v0  ;;  %v42_v1 = vsub.f32 0.0, %v36_v0  ;;  %v41_v15 = vsub.f32 1.0, %v37_v9  ;;  %s79_s1 = sshll.u32 %s164_s0, 4  ;;  %s80_s1 = int_to_ptr.vmem [resolvable:$true] %s79_s1 }
  0x1b   :  { %v56_v6 = vshrl.u32 %v55_v4, 7  ;;  %v58_v12 = vand.u32 127, %v55_v4  ;;  %s136_s19 = scalar_lea.vmem %s80_s1, 16  ;;  %s140_s20 = scalar_lea.vmem %s80_s1, 32 }
  0x1c   :  { %v43_v2 = vadd.f32 1.0, %v42_v1  ;;  %v46_v3 = vmul.f32 -0.5, %v42_v1  ;;  %v49_v8 = vand.u32 2147483647, %v42_v1  ;;  %p137_p10 = scmp.ne.s32.totalorder %s80_s1, %s136_s19  ;;  %p141_p11 = scmp.lt.s32.totalorder %s80_s1, %s80_s1 }
  0x1d   :  { %v62_v13 = vmul.u32 128, %v56_v6  ;;  %p142_p12 = scmp.lt.s32.totalorder %s140_s20, %s136_s19 }
  0x1e   :  { %94 = vlog2.f32 %v43_v2  ;;  %v47_v5 = vadd.f32 1.0, %v46_v3  ;;  %vm50_vm0 = vcmp.lt.f32.partialorder %v49_v8, 0.0004427343 }
  0x1f   :  { %v63_v19 = vadd.s32 %v62_v13, %v58_v12  ;;  %p143_p13 = por %p142_p12, %p141_p11 }
  0x20   :  { %v48_v11 = vmul.f32 %v47_v5, %v42_v1 }
  0x21   :  { %vm64_vm1 = vcmp.lt.s32.totalorder %v63_v19, 8  ;;  %p144_p0 = pnand %p143_p13, %p137_p10 }
  0x27   :  { %v93_v7 = vpop.eup %92 }
  0x28   :  { %v39_v10 = vmul.f32 0.6931472, %v93_v7 }
  0x2a   :  { %v40_v17 = vmul.f32 %v39_v10, %v37_v9 }
  0x2b   :  { %v95_v14 = vpop.eup %94 }
  0x2c   :  { %v45_v16 = vmul.f32 0.6931472, %v95_v14 }
  0x2e   :  { %v51_v18 = vsel %vm50_vm0, %v48_v11, %v45_v16 }
  0x2f   :  { %v52_v20 = vmul.f32 %v51_v18, %v41_v15 }
  0x31   :  { %v53_v21 = vadd.f32 %v52_v20, %v40_v17 }
  0x33   :  { %v54_v22 = vsub.f32 0.0, %v53_v21 }
  0x35   :  { %v65_v23 = vsel %vm64_vm1, %v54_v22, 0.0 }
  0x36   :  { %v66_v24 = vrot.slane %v65_v23, 4 }
  0x38   :  { %v67_v25 = vadd.f32 %v66_v24, %v65_v23 }
  0x3a   :  { %v68_v26 = vrot.slane %v67_v25, 2 }
  0x3c   :  { %v69_v27 = vadd.f32 %v68_v26, %v67_v25 }
  0x3e   :  { %v70_v28 = vrot.slane %v69_v27, 1 }
  0x40   :  { %v71_v29 = vadd.f32 %v70_v28, %v69_v27 }
  0x42   :  { %72 = vst [vmem:[#allocation7] sm:$0x1] %v71_v29 }
  0x43   :  { %147 = shalt.err (!%p144_p0)
}
  0x44   :  { %82 = dma.vmem_to_hbm [thread:$0]  %s80_s1, 16, %s191_s2, [#allocation4]  }
  0x45   :  { %160 = dma.done.wait [#allocation4], 16  }
  0x46   :  { %161 = vsyncadd [#allocation4], 4294967280 }
  0x47   :  { %86 = vsyncpa [#allocation3], 1 }
  0x48   :  { %87 = vsyncpa [#allocation6], 1 }
  0x49   :  { %88 = vsyncpa [#allocation4], 1 }

</bundles_post_ra>
